<compile_context>
chip_gen: v5e
topology: v5e:2x2
jax: 0.10.0
libtpu: 0.0.40
codegen_flags: <defaults>
</compile_context>

<pallas_src>
import functools

import jax
import jax.numpy as jnp
import numpy as np
from jax import lax
from jax.experimental import pallas as pl
from jax.experimental.pallas import tpu as pltpu


# ---------------------------------------------------------------------------
# Kernel 1: fused QKV projection, head-major bf16 output, scale folded into q.
# ---------------------------------------------------------------------------
def _qkv_proj_kernel(x_ref, wq_ref, bq_ref, wk_ref, wv_ref, bv_ref,
                     q_ref, k_ref, v_ref, *, n_head: int):
    x = x_ref[0]                                     # (TQ, n_state) bf16
    for h in range(n_head):                          # static unroll (small)
        q = jnp.dot(x, wq_ref[h], preferred_element_type=jnp.float32) + bq_ref[h]
        q_ref[0, h] = q.astype(q_ref.dtype)
        k = jnp.dot(x, wk_ref[h], preferred_element_type=jnp.float32)
        k_ref[0, h] = k.astype(k_ref.dtype)
        v = jnp.dot(x, wv_ref[h], preferred_element_type=jnp.float32) + bv_ref[h]
        v_ref[0, h] = v.astype(v_ref.dtype)


# ---------------------------------------------------------------------------
# Kernel 2: flash-style attention (online softmax) + pre-softmax score output.
# ---------------------------------------------------------------------------
def _flash_attn_kernel(q_ref, k_ref, v_ref, qk_ref, wv_ref, m_sc, l_sc, acc_sc):
    ki = pl.program_id(3)

    @pl.when(ki == 0)
    def _():
        m_sc[...] = jnp.full(m_sc.shape, -jnp.inf, dtype=m_sc.dtype)
        l_sc[...] = jnp.zeros(l_sc.shape, dtype=l_sc.dtype)
        acc_sc[...] = jnp.zeros(acc_sc.shape, dtype=acc_sc.dtype)

    q = q_ref[0, 0]                                  # (TQ, d) bf16, pre-scaled
    k = k_ref[0, 0]                                  # (TK, d) bf16
    v = v_ref[0, 0]                                  # (TK, d) bf16

    # Contract on d directly -- no materialized k transpose (XLU stays idle).
    s = lax.dot_general(q, k, (((1,), (1,)), ((), ())),
                        preferred_element_type=jnp.float32)   # (TQ, TK) f32
    qk_ref[0, 0] = s                                 # module returns raw scores

    m_prev = m_sc[...]
    m_new = jnp.maximum(m_prev, jnp.max(s, axis=-1, keepdims=True))
    alpha = jnp.exp(m_prev - m_new)
    p = jnp.exp(s - m_new)
    l_sc[...] = alpha * l_sc[...] + jnp.sum(p, axis=-1, keepdims=True)
    acc_sc[...] = alpha * acc_sc[...] + jnp.dot(p.astype(v.dtype), v,
                                                preferred_element_type=jnp.float32)
    m_sc[...] = m_new

    @pl.when(ki == pl.num_programs(3) - 1)
    def _():
        inv_l = pl.reciprocal(l_sc[...], approx=True)
        wv_ref[0, 0] = (acc_sc[...] * inv_l).astype(wv_ref.dtype)


# ---------------------------------------------------------------------------
# Kernel 3: output projection from head-major wv (accumulate over heads).
# ---------------------------------------------------------------------------
def _out_proj_kernel(wv_ref, wo_ref, bo_ref, out_ref, *, n_head: int):
    tq = wv_ref.shape[2]
    n_state = wo_ref.shape[2]
    acc = jnp.zeros((tq, n_state), dtype=jnp.float32)
    for h in range(n_head):
        acc = acc + jnp.dot(wv_ref[0, h], wo_ref[h],
                            preferred_element_type=jnp.float32)
    out_ref[0] = (acc + bo_ref[0]).astype(out_ref.dtype)


# ---------------------------------------------------------------------------
# Wrapper
# ---------------------------------------------------------------------------
def multi_head_attention(x, params, n_head: int, *,
                         block_q: int = 128, block_k: int = 128):
    """x: (batch, n_ctx, n_state) f32. params: PyTorch-layout weights."""
    batch, n_ctx, n_state = x.shape
    assert n_state % n_head == 0
    d = n_state // n_head

    tq = min(block_q, n_ctx)
    tk = min(block_k, n_ctx)
    assert n_ctx % tq == 0 and n_ctx % tk == 0, "n_ctx must be tileable"
    nq, nk = n_ctx // tq, n_ctx // tk

    f32, bf16 = jnp.float32, jnp.bfloat16
    scale = float(d) ** (-0.5)   # == (d**-0.25 on q) * (d**-0.25 on k)

    # PyTorch Linear weights are (out, in); transpose to (in, out), split the
    # out axis head-major, fold the attention scale into the static query
    # weights, cast matmul operands to bf16 (wrapper glue, not the hot path).
    def head_major(w):           # (out, in) -> (n_head, n_state_in, d)
        return jnp.transpose(w.T.reshape(n_state, n_head, d), (1, 0, 2))

    wq_h = (head_major(params["wq"]) * scale).astype(bf16)
    wk_h = head_major(params["wk"]).astype(bf16)
    wv_h = head_major(params["wv"]).astype(bf16)
    bq_h = (params["bq"].reshape(n_head, d) * scale).astype(f32)
    bv_h = params["bv"].reshape(n_head, d).astype(f32)
    wo_h = params["wo"].T.reshape(n_head, d, n_state).astype(bf16)
    bo = params["bo"].reshape(1, n_state).astype(f32)
    x_bf = x.astype(bf16)

    vmem_limit = 64 * 1024 * 1024

    w_spec = pl.BlockSpec((n_head, n_state, d), lambda b, i: (0, 0, 0))
    b_spec = pl.BlockSpec((n_head, d), lambda b, i: (0, 0))
    qkv_spec = pl.BlockSpec((1, n_head, tq, d), lambda b, i: (b, 0, i, 0))

    # ---- 1) QKV projection -------------------------------------------------
    q, k, v = pl.pallas_call(
        functools.partial(_qkv_proj_kernel, n_head=n_head),
        out_shape=tuple(jax.ShapeDtypeStruct((batch, n_head, n_ctx, d), bf16)
                        for _ in range(3)),
        grid=(batch, nq),
        in_specs=[
            pl.BlockSpec((1, tq, n_state), lambda b, i: (b, i, 0)),   # x
            w_spec, b_spec,          # query W, b (scale folded in)
            w_spec,                  # key W (bias=False)
            w_spec, b_spec,          # value W, b
        ],
        out_specs=(qkv_spec, qkv_spec, qkv_spec),
        compiler_params=pltpu.CompilerParams(
            dimension_semantics=("parallel", "parallel"),
            vmem_limit_bytes=vmem_limit),
    )(x_bf, wq_h, bq_h, wk_h, wv_h, bv_h)

    # ---- 2) flash attention (online softmax) + qk scores --------------------
    cost = pl.CostEstimate(
        flops=int(4 * batch * n_head * n_ctx * n_ctx * d),
        transcendentals=int(batch * n_head * n_ctx * n_ctx),
        bytes_accessed=int(4 * batch * n_head * n_ctx * n_ctx
                           + 4 * 2 * batch * n_head * n_ctx * d),
    )
    qk, wv = pl.pallas_call(
        _flash_attn_kernel,
        out_shape=(
            jax.ShapeDtypeStruct((batch, n_head, n_ctx, n_ctx), f32),
            jax.ShapeDtypeStruct((batch, n_head, n_ctx, d), bf16),
        ),
        grid=(batch, n_head, nq, nk),
        in_specs=[
            pl.BlockSpec((1, 1, tq, d), lambda b, h, qi, ki: (b, h, qi, 0)),
            pl.BlockSpec((1, 1, tk, d), lambda b, h, qi, ki: (b, h, ki, 0)),
            pl.BlockSpec((1, 1, tk, d), lambda b, h, qi, ki: (b, h, ki, 0)),
        ],
        out_specs=(
            pl.BlockSpec((1, 1, tq, tk), lambda b, h, qi, ki: (b, h, qi, ki)),
            pl.BlockSpec((1, 1, tq, d), lambda b, h, qi, ki: (b, h, qi, 0)),
        ),
        scratch_shapes=[
            pltpu.VMEM((tq, 1), f32),    # running max  m
            pltpu.VMEM((tq, 1), f32),    # running denom l
            pltpu.VMEM((tq, d), f32),    # unnormalized accumulator
        ],
        compiler_params=pltpu.CompilerParams(
            dimension_semantics=("parallel", "parallel", "parallel", "arbitrary"),
            vmem_limit_bytes=vmem_limit),
        cost_estimate=cost,
    )(q, k, v)

    # ---- 3) output projection -----------------------------------------------
    out = pl.pallas_call(
        functools.partial(_out_proj_kernel, n_head=n_head),
        out_shape=jax.ShapeDtypeStruct((batch, n_ctx, n_state), x.dtype),
        grid=(batch, nq),
        in_specs=[
            pl.BlockSpec((1, n_head, tq, d), lambda b, i: (b, 0, i, 0)),  # wv
            pl.BlockSpec((n_head, d, n_state), lambda b, i: (0, 0, 0)),   # Wo
            pl.BlockSpec((1, n_state), lambda b, i: (0, 0)),              # bo
        ],
        out_specs=pl.BlockSpec((1, tq, n_state), lambda b, i: (b, i, 0)),
        compiler_params=pltpu.CompilerParams(
            dimension_semantics=("parallel", "parallel"),
            vmem_limit_bytes=vmem_limit),
    )(wv, wo_h, bo)

    return out, qk


def _reference(x, params, n_head):
    """Pure-JAX f32 reference mirroring the PyTorch forward exactly."""
    n_batch, n_ctx, n_state = x.shape
    d = n_state // n_head
    scale = float(d) ** (-0.25)
    q = x @ params["wq"].T + params["bq"]
    k = x @ params["wk"].T
    v = x @ params["wv"].T + params["bv"]
    q = q.reshape(n_batch, n_ctx, n_head, d).transpose(0, 2, 1, 3) * scale
    k = k.reshape(n_batch, n_ctx, n_head, d).transpose(0, 2, 3, 1) * scale
    v = v.reshape(n_batch, n_ctx, n_head, d).transpose(0, 2, 1, 3)
    qk = q @ k
    w = jax.nn.softmax(qk, axis=-1)
    wv = (w @ v).transpose(0, 2, 1, 3).reshape(n_batch, n_ctx, n_state)
    out = wv @ params["wo"].T + params["bo"]
    return out, qk


if __name__ == "__main__":
    def run_and_check(batch, n_ctx, n_state, n_head, seed):
        key = jax.random.PRNGKey(seed)
        ks = jax.random.split(key, 8)
        wscale = 1.0 / np.sqrt(n_state)
        params = {
            "wq": jax.random.normal(ks[0], (n_state, n_state), jnp.float32) * wscale,
            "bq": jax.random.normal(ks[1], (n_state,), jnp.float32) * wscale,
            "wk": jax.random.normal(ks[2], (n_state, n_state), jnp.float32) * wscale,
            "wv": jax.random.normal(ks[3], (n_state, n_state), jnp.float32) * wscale,
            "bv": jax.random.normal(ks[4], (n_state,), jnp.float32) * wscale,
            "wo": jax.random.normal(ks[5], (n_state, n_state), jnp.float32) * wscale,
            "bo": jax.random.normal(ks[6], (n_state,), jnp.float32) * wscale,
        }
        x = jax.random.normal(ks[7], (batch, n_ctx, n_state), jnp.float32)

        out, qk = multi_head_attention(x, params, n_head)
        out = jax.block_until_ready(out)
        qk = jax.block_until_ready(qk)

        out_ref, qk_ref = _reference(x, params, n_head)
        # bf16 MXU inputs (f32 accumulation) -> compare to the f32 reference
        # at bf16-level tolerances.
        np.testing.assert_allclose(np.asarray(qk), np.asarray(qk_ref),
                                   rtol=5e-2, atol=5e-2)
        np.testing.assert_allclose(np.asarray(out), np.asarray(out_ref),
                                   rtol=5e-2, atol=5e-2)

    # Tiny shape (single tile along every axis).
    run_and_check(batch=2, n_ctx=8, n_state=32, n_head=4, seed=0)
    # Multi-tile shape: 2 q-tiles x 2 k-tiles exercises the online-softmax
    # accumulation and the tiled qk writeback (tq = tk = 128, lane-aligned).
    run_and_check(batch=2, n_ctx=256, n_state=32, n_head=4, seed=0)

    print("KERNEL_OK")
</pallas_src>

<mosaic_0001>
module attributes {stable_mosaic.version = 11 : i64} {
  func.func @_qkv_proj_kernel(%arg0: i32, %arg1: i32, %arg2: memref<1x8x32xbf16, #tpu.memory_space<vmem>>, %arg3: memref<4x32x8xbf16, #tpu.memory_space<vmem>>, %arg4: memref<4x8xf32, #tpu.memory_space<vmem>>, %arg5: memref<4x32x8xbf16, #tpu.memory_space<vmem>>, %arg6: memref<4x32x8xbf16, #tpu.memory_space<vmem>>, %arg7: memref<4x8xf32, #tpu.memory_space<vmem>>, %arg8: memref<1x4x8x8xbf16, #tpu.memory_space<vmem>>, %arg9: memref<1x4x8x8xbf16, #tpu.memory_space<vmem>>, %arg10: memref<1x4x8x8xbf16, #tpu.memory_space<vmem>>) attributes {dimension_semantics = [#tpu.dimension_semantics<parallel>, #tpu.dimension_semantics<parallel>], iteration_bounds = array<i64: 2, 1>, scalar_prefetch = 0 : i64, scratch_operands = 0 : i64, tpu.core_type = #tpu.core_type<tc>, window_params = [{transform_indices = @transform_0, window_bounds = array<i64: 1, 8, 32>}, {pipeline_mode = #tpu.pipeline_mode<synchronous>, transform_indices = @transform_1, window_bounds = array<i64: 4, 32, 8>}, {pipeline_mode = #tpu.pipeline_mode<synchronous>, transform_indices = @transform_2, window_bounds = array<i64: 4, 8>}, {pipeline_mode = #tpu.pipeline_mode<synchronous>, transform_indices = @transform_3, window_bounds = array<i64: 4, 32, 8>}, {pipeline_mode = #tpu.pipeline_mode<synchronous>, transform_indices = @transform_4, window_bounds = array<i64: 4, 32, 8>}, {pipeline_mode = #tpu.pipeline_mode<synchronous>, transform_indices = @transform_5, window_bounds = array<i64: 4, 8>}, {transform_indices = @transform_6, window_bounds = array<i64: 1, 4, 8, 8>}, {transform_indices = @transform_7, window_bounds = array<i64: 1, 4, 8, 8>}, {transform_indices = @transform_8, window_bounds = array<i64: 1, 4, 8, 8>}]} {
    %c0 = arith.constant 0 : index
    %c0_0 = arith.constant 0 : index
    %c0_1 = arith.constant 0 : index
    %0 = vector.load %arg2[%c0, %c0_0, %c0_1] : memref<1x8x32xbf16, #tpu.memory_space<vmem>>, vector<1x8x32xbf16>
    %1 = vector.shape_cast %0 : vector<1x8x32xbf16> to vector<8x32xbf16>
    %c0_2 = arith.constant 0 : index
    %c0_3 = arith.constant 0 : index
    %c0_4 = arith.constant 0 : index
    %2 = vector.load %arg3[%c0_2, %c0_3, %c0_4] : memref<4x32x8xbf16, #tpu.memory_space<vmem>>, vector<1x32x8xbf16>
    %3 = vector.shape_cast %2 : vector<1x32x8xbf16> to vector<32x8xbf16>
    %cst = arith.constant dense<0.000000e+00> : vector<8x8xf32>
    %4 = tpu.matmul %1, %3, %cst {dimension_numbers = #tpu.dot_dimension_numbers<[1], [0], [0], [1], [0, 0, 1, 1], [], []>} : vector<8x32xbf16>, vector<32x8xbf16>, vector<8x8xf32> -> vector<8x8xf32>
    %c0_5 = arith.constant 0 : index
    %c0_6 = arith.constant 0 : index
    %5 = vector.load %arg4[%c0_5, %c0_6] : memref<4x8xf32, #tpu.memory_space<vmem>>, vector<1x8xf32>
    %6 = vector.shape_cast %5 : vector<1x8xf32> to vector<8xf32>
    %7 = vector.shape_cast %6 : vector<8xf32> to vector<1x8xf32>
    %8 = vector.broadcast %7 : vector<1x8xf32> to vector<8x8xf32>
    %9 = arith.addf %4, %8 : vector<8x8xf32>
    %10 = arith.truncf %9 : vector<8x8xf32> to vector<8x8xbf16>
    %c0_7 = arith.constant 0 : index
    %c0_8 = arith.constant 0 : index
    %c0_9 = arith.constant 0 : index
    %c0_10 = arith.constant 0 : index
    %11 = vector.load %arg8[%c0_7, %c0_8, %c0_9, %c0_10] : memref<1x4x8x8xbf16, #tpu.memory_space<vmem>>, vector<1x1x8x8xbf16>
    %12 = vector.shape_cast %11 : vector<1x1x8x8xbf16> to vector<8x8xbf16>
    %13 = vector.shape_cast %10 : vector<8x8xbf16> to vector<1x1x8x8xbf16>
    tpu.vector_store %arg8[%c0_7, %c0_8, %c0_9, %c0_10], %13 {strides = array<i32>} : memref<1x4x8x8xbf16, #tpu.memory_space<vmem>>, vector<1x1x8x8xbf16>,
    %c0_11 = arith.constant 0 : index
    %c0_12 = arith.constant 0 : index
    %c0_13 = arith.constant 0 : index
    %14 = vector.load %arg5[%c0_11, %c0_12, %c0_13] : memref<4x32x8xbf16, #tpu.memory_space<vmem>>, vector<1x32x8xbf16>
    %15 = vector.shape_cast %14 : vector<1x32x8xbf16> to vector<32x8xbf16>
    %cst_14 = arith.constant dense<0.000000e+00> : vector<8x8xf32>
    %16 = tpu.matmul %1, %15, %cst_14 {dimension_numbers = #tpu.dot_dimension_numbers<[1], [0], [0], [1], [0, 0, 1, 1], [], []>} : vector<8x32xbf16>, vector<32x8xbf16>, vector<8x8xf32> -> vector<8x8xf32>
    %17 = arith.truncf %16 : vector<8x8xf32> to vector<8x8xbf16>
    %c0_15 = arith.constant 0 : index
    %c0_16 = arith.constant 0 : index
    %c0_17 = arith.constant 0 : index
    %c0_18 = arith.constant 0 : index
    %18 = vector.load %arg9[%c0_15, %c0_16, %c0_17, %c0_18] : memref<1x4x8x8xbf16, #tpu.memory_space<vmem>>, vector<1x1x8x8xbf16>
    %19 = vector.shape_cast %18 : vector<1x1x8x8xbf16> to vector<8x8xbf16>
    %20 = vector.shape_cast %17 : vector<8x8xbf16> to vector<1x1x8x8xbf16>
    tpu.vector_store %arg9[%c0_15, %c0_16, %c0_17, %c0_18], %20 {strides = array<i32>} : memref<1x4x8x8xbf16, #tpu.memory_space<vmem>>, vector<1x1x8x8xbf16>,
    %c0_19 = arith.constant 0 : index
    %c0_20 = arith.constant 0 : index
    %c0_21 = arith.constant 0 : index
    %21 = vector.load %arg6[%c0_19, %c0_20, %c0_21] : memref<4x32x8xbf16, #tpu.memory_space<vmem>>, vector<1x32x8xbf16>
    %22 = vector.shape_cast %21 : vector<1x32x8xbf16> to vector<32x8xbf16>
    %cst_22 = arith.constant dense<0.000000e+00> : vector<8x8xf32>
    %23 = tpu.matmul %1, %22, %cst_22 {dimension_numbers = #tpu.dot_dimension_numbers<[1], [0], [0], [1], [0, 0, 1, 1], [], []>} : vector<8x32xbf16>, vector<32x8xbf16>, vector<8x8xf32> -> vector<8x8xf32>
    %c0_23 = arith.constant 0 : index
    %c0_24 = arith.constant 0 : index
    %24 = vector.load %arg7[%c0_23, %c0_24] : memref<4x8xf32, #tpu.memory_space<vmem>>, vector<1x8xf32>
    %25 = vector.shape_cast %24 : vector<1x8xf32> to vector<8xf32>
    %26 = vector.shape_cast %25 : vector<8xf32> to vector<1x8xf32>
    %27 = vector.broadcast %26 : vector<1x8xf32> to vector<8x8xf32>
    %28 = arith.addf %23, %27 : vector<8x8xf32>
    %29 = arith.truncf %28 : vector<8x8xf32> to vector<8x8xbf16>
    %c0_25 = arith.constant 0 : index
    %c0_26 = arith.constant 0 : index
    %c0_27 = arith.constant 0 : index
    %c0_28 = arith.constant 0 : index
    %30 = vector.load %arg10[%c0_25, %c0_26, %c0_27, %c0_28] : memref<1x4x8x8xbf16, #tpu.memory_space<vmem>>, vector<1x1x8x8xbf16>
    %31 = vector.shape_cast %30 : vector<1x1x8x8xbf16> to vector<8x8xbf16>
    %32 = vector.shape_cast %29 : vector<8x8xbf16> to vector<1x1x8x8xbf16>
    tpu.vector_store %arg10[%c0_25, %c0_26, %c0_27, %c0_28], %32 {strides = array<i32>} : memref<1x4x8x8xbf16, #tpu.memory_space<vmem>>, vector<1x1x8x8xbf16>,
    %c1 = arith.constant 1 : index
    %c0_29 = arith.constant 0 : index
    %c0_30 = arith.constant 0 : index
    %33 = vector.load %arg3[%c1, %c0_29, %c0_30] : memref<4x32x8xbf16, #tpu.memory_space<vmem>>, vector<1x32x8xbf16>
    %34 = vector.shape_cast %33 : vector<1x32x8xbf16> to vector<32x8xbf16>
    %cst_31 = arith.constant dense<0.000000e+00> : vector<8x8xf32>
    %35 = tpu.matmul %1, %34, %cst_31 {dimension_numbers = #tpu.dot_dimension_numbers<[1], [0], [0], [1], [0, 0, 1, 1], [], []>} : vector<8x32xbf16>, vector<32x8xbf16>, vector<8x8xf32> -> vector<8x8xf32>
    %c1_32 = arith.constant 1 : index
    %c0_33 = arith.constant 0 : index
    %36 = vector.load %arg4[%c1_32, %c0_33] : memref<4x8xf32, #tpu.memory_space<vmem>>, vector<1x8xf32>
    %37 = vector.shape_cast %36 : vector<1x8xf32> to vector<8xf32>
    %38 = vector.shape_cast %37 : vector<8xf32> to vector<1x8xf32>
    %39 = vector.broadcast %38 : vector<1x8xf32> to vector<8x8xf32>
    %40 = arith.addf %35, %39 : vector<8x8xf32>
    %41 = arith.truncf %40 : vector<8x8xf32> to vector<8x8xbf16>
    %c0_34 = arith.constant 0 : index
    %c1_35 = arith.constant 1 : index
    %c0_36 = arith.constant 0 : index
    %c0_37 = arith.constant 0 : index
    %42 = vector.load %arg8[%c0_34, %c1_35, %c0_36, %c0_37] : memref<1x4x8x8xbf16, #tpu.memory_space<vmem>>, vector<1x1x8x8xbf16>
    %43 = vector.shape_cast %42 : vector<1x1x8x8xbf16> to vector<8x8xbf16>
    %44 = vector.shape_cast %41 : vector<8x8xbf16> to vector<1x1x8x8xbf16>
    tpu.vector_store %arg8[%c0_34, %c1_35, %c0_36, %c0_37], %44 {strides = array<i32>} : memref<1x4x8x8xbf16, #tpu.memory_space<vmem>>, vector<1x1x8x8xbf16>,
    %c1_38 = arith.constant 1 : index
    %c0_39 = arith.constant 0 : index
    %c0_40 = arith.constant 0 : index
    %45 = vector.load %arg5[%c1_38, %c0_39, %c0_40] : memref<4x32x8xbf16, #tpu.memory_space<vmem>>, vector<1x32x8xbf16>
    %46 = vector.shape_cast %45 : vector<1x32x8xbf16> to vector<32x8xbf16>
    %cst_41 = arith.constant dense<0.000000e+00> : vector<8x8xf32>
    %47 = tpu.matmul %1, %46, %cst_41 {dimension_numbers = #tpu.dot_dimension_numbers<[1], [0], [0], [1], [0, 0, 1, 1], [], []>} : vector<8x32xbf16>, vector<32x8xbf16>, vector<8x8xf32> -> vector<8x8xf32>
    %48 = arith.truncf %47 : vector<8x8xf32> to vector<8x8xbf16>
    %c0_42 = arith.constant 0 : index
    %c1_43 = arith.constant 1 : index
    %c0_44 = arith.constant 0 : index
    %c0_45 = arith.constant 0 : index
    %49 = vector.load %arg9[%c0_42, %c1_43, %c0_44, %c0_45] : memref<1x4x8x8xbf16, #tpu.memory_space<vmem>>, vector<1x1x8x8xbf16>
    %50 = vector.shape_cast %49 : vector<1x1x8x8xbf16> to vector<8x8xbf16>
    %51 = vector.shape_cast %48 : vector<8x8xbf16> to vector<1x1x8x8xbf16>
    tpu.vector_store %arg9[%c0_42, %c1_43, %c0_44, %c0_45], %51 {strides = array<i32>} : memref<1x4x8x8xbf16, #tpu.memory_space<vmem>>, vector<1x1x8x8xbf16>,
    %c1_46 = arith.constant 1 : index
    %c0_47 = arith.constant 0 : index
    %c0_48 = arith.constant 0 : index
    %52 = vector.load %arg6[%c1_46, %c0_47, %c0_48] : memref<4x32x8xbf16, #tpu.memory_space<vmem>>, vector<1x32x8xbf16>
    %53 = vector.shape_cast %52 : vector<1x32x8xbf16> to vector<32x8xbf16>
    %cst_49 = arith.constant dense<0.000000e+00> : vector<8x8xf32>
    %54 = tpu.matmul %1, %53, %cst_49 {dimension_numbers = #tpu.dot_dimension_numbers<[1], [0], [0], [1], [0, 0, 1, 1], [], []>} : vector<8x32xbf16>, vector<32x8xbf16>, vector<8x8xf32> -> vector<8x8xf32>
    %c1_50 = arith.constant 1 : index
    %c0_51 = arith.constant 0 : index
    %55 = vector.load %arg7[%c1_50, %c0_51] : memref<4x8xf32, #tpu.memory_space<vmem>>, vector<1x8xf32>
    %56 = vector.shape_cast %55 : vector<1x8xf32> to vector<8xf32>
    %57 = vector.shape_cast %56 : vector<8xf32> to vector<1x8xf32>
    %58 = vector.broadcast %57 : vector<1x8xf32> to vector<8x8xf32>
    %59 = arith.addf %54, %58 : vector<8x8xf32>
    %60 = arith.truncf %59 : vector<8x8xf32> to vector<8x8xbf16>
    %c0_52 = arith.constant 0 : index
    %c1_53 = arith.constant 1 : index
    %c0_54 = arith.constant 0 : index
    %c0_55 = arith.constant 0 : index
    %61 = vector.load %arg10[%c0_52, %c1_53, %c0_54, %c0_55] : memref<1x4x8x8xbf16, #tpu.memory_space<vmem>>, vector<1x1x8x8xbf16>
    %62 = vector.shape_cast %61 : vector<1x1x8x8xbf16> to vector<8x8xbf16>
    %63 = vector.shape_cast %60 : vector<8x8xbf16> to vector<1x1x8x8xbf16>
    tpu.vector_store %arg10[%c0_52, %c1_53, %c0_54, %c0_55], %63 {strides = array<i32>} : memref<1x4x8x8xbf16, #tpu.memory_space<vmem>>, vector<1x1x8x8xbf16>,
    %c2 = arith.constant 2 : index
    %c0_56 = arith.constant 0 : index
    %c0_57 = arith.constant 0 : index
    %64 = vector.load %arg3[%c2, %c0_56, %c0_57] : memref<4x32x8xbf16, #tpu.memory_space<vmem>>, vector<1x32x8xbf16>
    %65 = vector.shape_cast %64 : vector<1x32x8xbf16> to vector<32x8xbf16>
    %cst_58 = arith.constant dense<0.000000e+00> : vector<8x8xf32>
    %66 = tpu.matmul %1, %65, %cst_58 {dimension_numbers = #tpu.dot_dimension_numbers<[1], [0], [0], [1], [0, 0, 1, 1], [], []>} : vector<8x32xbf16>, vector<32x8xbf16>, vector<8x8xf32> -> vector<8x8xf32>
    %c2_59 = arith.constant 2 : index
    %c0_60 = arith.constant 0 : index
    %67 = vector.load %arg4[%c2_59, %c0_60] : memref<4x8xf32, #tpu.memory_space<vmem>>, vector<1x8xf32>
    %68 = vector.shape_cast %67 : vector<1x8xf32> to vector<8xf32>
    %69 = vector.shape_cast %68 : vector<8xf32> to vector<1x8xf32>
    %70 = vector.broadcast %69 : vector<1x8xf32> to vector<8x8xf32>
    %71 = arith.addf %66, %70 : vector<8x8xf32>
    %72 = arith.truncf %71 : vector<8x8xf32> to vector<8x8xbf16>
    %c0_61 = arith.constant 0 : index
    %c2_62 = arith.constant 2 : index
    %c0_63 = arith.constant 0 : index
    %c0_64 = arith.constant 0 : index
    %73 = vector.load %arg8[%c0_61, %c2_62, %c0_63, %c0_64] : memref<1x4x8x8xbf16, #tpu.memory_space<vmem>>, vector<1x1x8x8xbf16>
    %74 = vector.shape_cast %73 : vector<1x1x8x8xbf16> to vector<8x8xbf16>
    %75 = vector.shape_cast %72 : vector<8x8xbf16> to vector<1x1x8x8xbf16>
    tpu.vector_store %arg8[%c0_61, %c2_62, %c0_63, %c0_64], %75 {strides = array<i32>} : memref<1x4x8x8xbf16, #tpu.memory_space<vmem>>, vector<1x1x8x8xbf16>,
    %c2_65 = arith.constant 2 : index
    %c0_66 = arith.constant 0 : index
    %c0_67 = arith.constant 0 : index
    %76 = vector.load %arg5[%c2_65, %c0_66, %c0_67] : memref<4x32x8xbf16, #tpu.memory_space<vmem>>, vector<1x32x8xbf16>
    %77 = vector.shape_cast %76 : vector<1x32x8xbf16> to vector<32x8xbf16>
    %cst_68 = arith.constant dense<0.000000e+00> : vector<8x8xf32>
    %78 = tpu.matmul %1, %77, %cst_68 {dimension_numbers = #tpu.dot_dimension_numbers<[1], [0], [0], [1], [0, 0, 1, 1], [], []>} : vector<8x32xbf16>, vector<32x8xbf16>, vector<8x8xf32> -> vector<8x8xf32>
    %79 = arith.truncf %78 : vector<8x8xf32> to vector<8x8xbf16>
    %c0_69 = arith.constant 0 : index
    %c2_70 = arith.constant 2 : index
    %c0_71 = arith.constant 0 : index
    %c0_72 = arith.constant 0 : index
    %80 = vector.load %arg9[%c0_69, %c2_70, %c0_71, %c0_72] : memref<1x4x8x8xbf16, #tpu.memory_space<vmem>>, vector<1x1x8x8xbf16>
    %81 = vector.shape_cast %80 : vector<1x1x8x8xbf16> to vector<8x8xbf16>
    %82 = vector.shape_cast %79 : vector<8x8xbf16> to vector<1x1x8x8xbf16>
    tpu.vector_store %arg9[%c0_69, %c2_70, %c0_71, %c0_72], %82 {strides = array<i32>} : memref<1x4x8x8xbf16, #tpu.memory_space<vmem>>, vector<1x1x8x8xbf16>,
    %c2_73 = arith.constant 2 : index
    %c0_74 = arith.constant 0 : index
    %c0_75 = arith.constant 0 : index
    %83 = vector.load %arg6[%c2_73, %c0_74, %c0_75] : memref<4x32x8xbf16, #tpu.memory_space<vmem>>, vector<1x32x8xbf16>
    %84 = vector.shape_cast %83 : vector<1x32x8xbf16> to vector<32x8xbf16>
    %cst_76 = arith.constant dense<0.000000e+00> : vector<8x8xf32>
    %85 = tpu.matmul %1, %84, %cst_76 {dimension_numbers = #tpu.dot_dimension_numbers<[1], [0], [0], [1], [0, 0, 1, 1], [], []>} : vector<8x32xbf16>, vector<32x8xbf16>, vector<8x8xf32> -> vector<8x8xf32>
    %c2_77 = arith.constant 2 : index
    %c0_78 = arith.constant 0 : index
    %86 = vector.load %arg7[%c2_77, %c0_78] : memref<4x8xf32, #tpu.memory_space<vmem>>, vector<1x8xf32>
    %87 = vector.shape_cast %86 : vector<1x8xf32> to vector<8xf32>
    %88 = vector.shape_cast %87 : vector<8xf32> to vector<1x8xf32>
    %89 = vector.broadcast %88 : vector<1x8xf32> to vector<8x8xf32>
    %90 = arith.addf %85, %89 : vector<8x8xf32>
    %91 = arith.truncf %90 : vector<8x8xf32> to vector<8x8xbf16>
    %c0_79 = arith.constant 0 : index
    %c2_80 = arith.constant 2 : index
    %c0_81 = arith.constant 0 : index
    %c0_82 = arith.constant 0 : index
    %92 = vector.load %arg10[%c0_79, %c2_80, %c0_81, %c0_82] : memref<1x4x8x8xbf16, #tpu.memory_space<vmem>>, vector<1x1x8x8xbf16>
    %93 = vector.shape_cast %92 : vector<1x1x8x8xbf16> to vector<8x8xbf16>
    %94 = vector.shape_cast %91 : vector<8x8xbf16> to vector<1x1x8x8xbf16>
    tpu.vector_store %arg10[%c0_79, %c2_80, %c0_81, %c0_82], %94 {strides = array<i32>} : memref<1x4x8x8xbf16, #tpu.memory_space<vmem>>, vector<1x1x8x8xbf16>,
    %c3 = arith.constant 3 : index
    %c0_83 = arith.constant 0 : index
    %c0_84 = arith.constant 0 : index
    %95 = vector.load %arg3[%c3, %c0_83, %c0_84] : memref<4x32x8xbf16, #tpu.memory_space<vmem>>, vector<1x32x8xbf16>
    %96 = vector.shape_cast %95 : vector<1x32x8xbf16> to vector<32x8xbf16>
    %cst_85 = arith.constant dense<0.000000e+00> : vector<8x8xf32>
    %97 = tpu.matmul %1, %96, %cst_85 {dimension_numbers = #tpu.dot_dimension_numbers<[1], [0], [0], [1], [0, 0, 1, 1], [], []>} : vector<8x32xbf16>, vector<32x8xbf16>, vector<8x8xf32> -> vector<8x8xf32>
    %c3_86 = arith.constant 3 : index
    %c0_87 = arith.constant 0 : index
    %98 = vector.load %arg4[%c3_86, %c0_87] : memref<4x8xf32, #tpu.memory_space<vmem>>, vector<1x8xf32>
    %99 = vector.shape_cast %98 : vector<1x8xf32> to vector<8xf32>
    %100 = vector.shape_cast %99 : vector<8xf32> to vector<1x8xf32>
    %101 = vector.broadcast %100 : vector<1x8xf32> to vector<8x8xf32>
    %102 = arith.addf %97, %101 : vector<8x8xf32>
    %103 = arith.truncf %102 : vector<8x8xf32> to vector<8x8xbf16>
    %c0_88 = arith.constant 0 : index
    %c3_89 = arith.constant 3 : index
    %c0_90 = arith.constant 0 : index
    %c0_91 = arith.constant 0 : index
    %104 = vector.load %arg8[%c0_88, %c3_89, %c0_90, %c0_91] : memref<1x4x8x8xbf16, #tpu.memory_space<vmem>>, vector<1x1x8x8xbf16>
    %105 = vector.shape_cast %104 : vector<1x1x8x8xbf16> to vector<8x8xbf16>
    %106 = vector.shape_cast %103 : vector<8x8xbf16> to vector<1x1x8x8xbf16>
    tpu.vector_store %arg8[%c0_88, %c3_89, %c0_90, %c0_91], %106 {strides = array<i32>} : memref<1x4x8x8xbf16, #tpu.memory_space<vmem>>, vector<1x1x8x8xbf16>,
    %c3_92 = arith.constant 3 : index
    %c0_93 = arith.constant 0 : index
    %c0_94 = arith.constant 0 : index
    %107 = vector.load %arg5[%c3_92, %c0_93, %c0_94] : memref<4x32x8xbf16, #tpu.memory_space<vmem>>, vector<1x32x8xbf16>
    %108 = vector.shape_cast %107 : vector<1x32x8xbf16> to vector<32x8xbf16>
    %cst_95 = arith.constant dense<0.000000e+00> : vector<8x8xf32>
    %109 = tpu.matmul %1, %108, %cst_95 {dimension_numbers = #tpu.dot_dimension_numbers<[1], [0], [0], [1], [0, 0, 1, 1], [], []>} : vector<8x32xbf16>, vector<32x8xbf16>, vector<8x8xf32> -> vector<8x8xf32>
    %110 = arith.truncf %109 : vector<8x8xf32> to vector<8x8xbf16>
    %c0_96 = arith.constant 0 : index
    %c3_97 = arith.constant 3 : index
    %c0_98 = arith.constant 0 : index
    %c0_99 = arith.constant 0 : index
    %111 = vector.load %arg9[%c0_96, %c3_97, %c0_98, %c0_99] : memref<1x4x8x8xbf16, #tpu.memory_space<vmem>>, vector<1x1x8x8xbf16>
    %112 = vector.shape_cast %111 : vector<1x1x8x8xbf16> to vector<8x8xbf16>
    %113 = vector.shape_cast %110 : vector<8x8xbf16> to vector<1x1x8x8xbf16>
    tpu.vector_store %arg9[%c0_96, %c3_97, %c0_98, %c0_99], %113 {strides = array<i32>} : memref<1x4x8x8xbf16, #tpu.memory_space<vmem>>, vector<1x1x8x8xbf16>,
    %c3_100 = arith.constant 3 : index
    %c0_101 = arith.constant 0 : index
    %c0_102 = arith.constant 0 : index
    %114 = vector.load %arg6[%c3_100, %c0_101, %c0_102] : memref<4x32x8xbf16, #tpu.memory_space<vmem>>, vector<1x32x8xbf16>
    %115 = vector.shape_cast %114 : vector<1x32x8xbf16> to vector<32x8xbf16>
    %cst_103 = arith.constant dense<0.000000e+00> : vector<8x8xf32>
    %116 = tpu.matmul %1, %115, %cst_103 {dimension_numbers = #tpu.dot_dimension_numbers<[1], [0], [0], [1], [0, 0, 1, 1], [], []>} : vector<8x32xbf16>, vector<32x8xbf16>, vector<8x8xf32> -> vector<8x8xf32>
    %c3_104 = arith.constant 3 : index
    %c0_105 = arith.constant 0 : index
    %117 = vector.load %arg7[%c3_104, %c0_105] : memref<4x8xf32, #tpu.memory_space<vmem>>, vector<1x8xf32>
    %118 = vector.shape_cast %117 : vector<1x8xf32> to vector<8xf32>
    %119 = vector.shape_cast %118 : vector<8xf32> to vector<1x8xf32>
    %120 = vector.broadcast %119 : vector<1x8xf32> to vector<8x8xf32>
    %121 = arith.addf %116, %120 : vector<8x8xf32>
    %122 = arith.truncf %121 : vector<8x8xf32> to vector<8x8xbf16>
    %c0_106 = arith.constant 0 : index
    %c3_107 = arith.constant 3 : index
    %c0_108 = arith.constant 0 : index
    %c0_109 = arith.constant 0 : index
    %123 = vector.load %arg10[%c0_106, %c3_107, %c0_108, %c0_109] : memref<1x4x8x8xbf16, #tpu.memory_space<vmem>>, vector<1x1x8x8xbf16>
    %124 = vector.shape_cast %123 : vector<1x1x8x8xbf16> to vector<8x8xbf16>
    %125 = vector.shape_cast %122 : vector<8x8xbf16> to vector<1x1x8x8xbf16>
    tpu.vector_store %arg10[%c0_106, %c3_107, %c0_108, %c0_109], %125 {strides = array<i32>} : memref<1x4x8x8xbf16, #tpu.memory_space<vmem>>, vector<1x1x8x8xbf16>,
    return
  }
  func.func @transform_0(%arg0: i32, %arg1: i32) -> (i32, i32, i32) {
    %c0_i32 = arith.constant 0 : i32
    %c0_i32_0 = arith.constant 0 : i32
    return %arg0, %arg1, %c0_i32 : i32, i32, i32
  }
  func.func @transform_1(%arg0: i32, %arg1: i32) -> (i32, i32, i32) {
    %c0_i32 = arith.constant 0 : i32
    %c0_i32_0 = arith.constant 0 : i32
    %c0_i32_1 = arith.constant 0 : i32
    %c0_i32_2 = arith.constant 0 : i32
    return %c0_i32, %c0_i32_0, %c0_i32_1 : i32, i32, i32
  }
  func.func @transform_2(%arg0: i32, %arg1: i32) -> (i32, i32) {
    %c0_i32 = arith.constant 0 : i32
    %c0_i32_0 = arith.constant 0 : i32
    %c0_i32_1 = arith.constant 0 : i32
    return %c0_i32, %c0_i32_0 : i32, i32
  }
  func.func @transform_3(%arg0: i32, %arg1: i32) -> (i32, i32, i32) {
    %c0_i32 = arith.constant 0 : i32
    %c0_i32_0 = arith.constant 0 : i32
    %c0_i32_1 = arith.constant 0 : i32
    %c0_i32_2 = arith.constant 0 : i32
    return %c0_i32, %c0_i32_0, %c0_i32_1 : i32, i32, i32
  }
  func.func @transform_4(%arg0: i32, %arg1: i32) -> (i32, i32, i32) {
    %c0_i32 = arith.constant 0 : i32
    %c0_i32_0 = arith.constant 0 : i32
    %c0_i32_1 = arith.constant 0 : i32
    %c0_i32_2 = arith.constant 0 : i32
    return %c0_i32, %c0_i32_0, %c0_i32_1 : i32, i32, i32
  }
  func.func @transform_5(%arg0: i32, %arg1: i32) -> (i32, i32) {
    %c0_i32 = arith.constant 0 : i32
    %c0_i32_0 = arith.constant 0 : i32
    %c0_i32_1 = arith.constant 0 : i32
    return %c0_i32, %c0_i32_0 : i32, i32
  }
  func.func @transform_6(%arg0: i32, %arg1: i32) -> (i32, i32, i32, i32) {
    %c0_i32 = arith.constant 0 : i32
    %c0_i32_0 = arith.constant 0 : i32
    %c0_i32_1 = arith.constant 0 : i32
    return %arg0, %c0_i32, %arg1, %c0_i32_0 : i32, i32, i32, i32
  }
  func.func @transform_7(%arg0: i32, %arg1: i32) -> (i32, i32, i32, i32) {
    %c0_i32 = arith.constant 0 : i32
    %c0_i32_0 = arith.constant 0 : i32
    %c0_i32_1 = arith.constant 0 : i32
    return %arg0, %c0_i32, %arg1, %c0_i32_0 : i32, i32, i32, i32
  }
  func.func @transform_8(%arg0: i32, %arg1: i32) -> (i32, i32, i32, i32) {
    %c0_i32 = arith.constant 0 : i32
    %c0_i32_0 = arith.constant 0 : i32
    %c0_i32_1 = arith.constant 0 : i32
    return %arg0, %c0_i32, %arg1, %c0_i32_0 : i32, i32, i32, i32
  }
}

</mosaic_0001>

<bundles_post_ra>
// kernel: tpu_custom_call.1
= control target key start
LH: loop header
LB: loop body
LE: loop exit
PB: predicated region body
PF: predicated region fallthrough
CT: control target
= control target key end

     0   :  { %s1742_s0 = inlined_call_operand.vmem [shape: bf16[2,8,32], index: 0, kind: input, shape index: {}]   ;;  %s1743_s1 = inlined_call_operand.vmem [shape: bf16[4,32,8], index: 1, kind: input, shape index: {}]   ;;  %s1744_s2 = inlined_call_operand.vmem [shape: f32[4,8], index: 2, kind: input, shape index: {}]   ;;  %s1745_s3 = inlined_call_operand.vmem [shape: bf16[4,32,8], index: 3, kind: input, shape index: {}]   ;;  %s1746_s4 = inlined_call_operand.vmem [shape: bf16[4,32,8], index: 4, kind: input, shape index: {}]   ;;  %s1747_s5 = inlined_call_operand.vmem [shape: f32[4,8], index: 5, kind: input, shape index: {}]   ;;  %s1748_s6 = inlined_call_operand.hbm [shape: bf16[2,4,8,8], index: 6, kind: output, shape index: {0}]   ;;  %s1749_s7 = inlined_call_operand.hbm [shape: bf16[2,4,8,8], index: 7, kind: output, shape index: {1}]   ;;  %s1750_s8 = inlined_call_operand.hbm [shape: bf16[2,4,8,8], index: 8, kind: output, shape index: {2}]  }
   0x1   :  { %1755 = sst [smem:[#allocation10_spill]] %s1742_s0 }
   0x2   :  { %1756 = sst [smem:[#allocation11_spill]] %s1743_s1 }
   0x3   :  { %1757 = sst [smem:[#allocation12_spill]] %s1744_s2 }
   0x4   :  { %1758 = sst [smem:[#allocation13_spill]] %s1745_s3 }
   0x5   :  { %1759 = sst [smem:[#allocation14_spill]] %s1746_s4 }
   0x6   :  { %1760 = sst [smem:[#allocation15_spill]] %s1747_s5 }
   0x7   :  { %14 = vsyncpa [#allocation3], 0 }
   0x8   :  { %16 = vsyncpa [#allocation3 + $0x1], 0 }
   0x9   :  { %17 = vsyncpa [#allocation5], 0 }
   0xa   :  { %19 = vsyncpa [#allocation5 + $0x1], 0  ;;  %s1428_s27 = smov 0   ;;  %s1430_s28 = smov 0  }
   0xb   :  { %s1432_s29 = smov 0   ;;  %s1434_s30 = smov 0  }
   0xc   :  { %s1436_s9 = smov 0   ;;  %s1438_s10 = smov 0  }
   0xd LB: > { %s1752_s11 = sadd.s32 4294967295, %s1379_s10   ;;  %s1751_s12 = sadd.s32 4294967294, %s1379_s10   ;;  %s1379_s10 = sphi %s1438_s10, %s25_s10   ;;  %s1375_s9 = sphi %s1436_s9, %s1778_s9   ;;  %s1371_s30 = sphi %s1434_s30, %s1777_s30   ;;  %s1367_s29 = sphi %s1432_s29, %s1776_s29   ;;  %s1363_s28 = sphi %s1430_s28, %s1775_s28   ;;  %s1359_s27 = sphi %s1428_s27, %s1774_s27  }
   0xe   : > { %s37_s13 = sadd.s32 1, %s1375_s9  ;;  %s179_s14 = sadd.s32 1, %s1367_s29 }
   0xf   : > { %p39_p0 = scmp.ge.s32.totalorder %s37_s13, 2  ;;  %p189_p1 = scmp.ne.s32.totalorder %s1367_s29, %s1363_s28 }
  0x10   : > { %p190_p2 = scmp.eq.s32.totalorder %s1752_s11, 1  ;;  %p195_p3 = scmp.ne.s32.totalorder %s1363_s28, %s1359_s27 }
  0x11   : > { %s1780_s13 = smov (%p39_p0, %s37_s13), 0  ;;  %p196_p5 = scmp.eq.s32.totalorder %s1751_s12, 1 }
  0x12   : > { %1761 = sst [smem:[#allocation9_spill]] %s1780_s13  ;;  %p1470_p4 = por %p190_p2, %p189_p1 }
  0x13   : > { %s174_s16 = ssub.s32 %s1375_s9, %s1780_s13  ;;  %p970_p6 = scmp.ge.s32.totalorder %s1379_s10, 1 }
  0x14   : > { %p177_p7 = scmp.eq.s32.totalorder %s174_s16, 0  ;;  %p1479_p8 = por %p196_p5, %p195_p3 }
  0x15   : > { %p295_p9 = scmp.lt.s32.totalorder %s1379_s10, 3 }
  0x16   : > { %s1485_s18 = scalar_select %p177_p7, %s1367_s29, %s179_s14  }
  0x17   : > { %p296_p10 = pnand %p970_p6, %p295_p9 }
  0x18   : > { %s1764_s1 = sld [smem:[#allocation11_spill]] (!%p296_p10)  ;;  %p341_p11 = scmp.lt.s32.totalorder (!%p296_p10), %s1371_s30, 1 }
  0x19   : > { %299 = sbr.rel (%p296_p10) target bundleno = 231 (0xe7), region = 44  ;;  %s1765_s3 = sld [smem:[#allocation13_spill]] (!%p296_p10) }
  0x1a   : > { %s1766_s4 = sld [smem:[#allocation14_spill]] (!%p296_p10)  ;;  %s1163_s12 = sshll.u32 (!%p296_p10), %s1371_s30, 4 }
  0x1b   : > { %s1767_s0 = sld [smem:[#allocation10_spill]] (!%p296_p10)  ;;  %s784_s11 = scalar_lea.hbm (!%p296_p10), %s1748_s6, %s1163_s12 }
  0x1c   : > { %s1768_s2 = sld [smem:[#allocation12_spill]] (!%p296_p10)  ;;  %s802_s14 = scalar_lea.hbm (!%p296_p10), %s1749_s7, %s1163_s12 }
  0x1d   : > { %s1769_s5 = sld [smem:[#allocation15_spill]] (!%p296_p10) }
  0x1e   : > { %v1140_v0 = vld [vmem:[%s1764_s1 + $0x8] sm:$0xff]  ;;  %v1146_v3 = vld [vmem:[%s1764_s1 + $0x18] sm:$0xff]  ;;  %v1139_v4 = vld [vmem:[%s1764_s1] sm:$0xff]  ;;  %s342_s21 = scalar_select %p341_p11, %s1371_s30, 1  ;;  %vm368_vm0 = vcmask 261120   ;;  %vm386_vm1 = vcmask 60416  }
  0x1f   : > { %v1142_v1 = vld [vmem:[%s1765_s3 + $0x8] sm:$0xff]  ;;  %378 = vmatpush.bf16.msra.mxu0 %v1140_v0  ;;  %v1141_v5 = vld [vmem:[%s1765_s3] sm:$0xff]  ;;  %477 = vmatpush.bf16.msra.mxu3 %v1146_v3  ;;  %v1145_v7 = vld [vmem:[%s1764_s1 + $0x10] sm:$0xff]  ;;  %s1630_s30 = sshll.u32 %s784_s11, 4  ;;  %s1770_s11 = sadd.s32 4294967295, %s1379_s10   ;;  %s788_s30 = int_to_ptr.hbm [resolvable:$true] %s1630_s30 }
  0x20   : > { %v1144_v2 = vld [vmem:[%s1766_s4 + $0x8] sm:$0xff]  ;;  %410 = vmatpush.bf16.msra.mxu1 %v1142_v1  ;;  %v1143_v6 = vld [vmem:[%s1766_s4] sm:$0xff]  ;;  %s974_s26 = sshll.u32 %s342_s21, 2  ;;  %v1148_v11 = vld [vmem:[%s1765_s3 + $0x18] sm:$0xff]  ;;  %s1754_s21 = sand.u32 1, %s1363_s28  }
  0x21   : > { %443 = vmatpush.bf16.msra.mxu2 %v1144_v2  ;;  %v1152_v8 = vld [vmem:[%s1764_s1 + $0x28] sm:$0xff]  ;;  %s347_s13 = scalar_lea.vmem %s1767_s0, %s974_s26  ;;  %v1150_v12 = vld [vmem:[%s1766_s4 + $0x18] sm:$0xff]  ;;  %v1151_v13 = vld [vmem:[%s1764_s1 + $0x20] sm:$0xff]  ;;  %s971_s24 = sshll.u32 %s1754_s21, 4 }
  0x22   : > { %v1154_v9 = vld [vmem:[%s1765_s3 + $0x28] sm:$0xff]  ;;  %v349_v10 = vld [vmem:[%s347_s13] sm:$0xf]  ;;  %v1160_v15 = vld [vmem:[%s1765_s3 + $0x38] sm:$0xff]  ;;  %s1582_s25 = scalar_lea.vmem [#allocation4], %s971_s24  ;;  %s1592_s19 = scalar_lea.vmem [#allocation2], %s971_s24 }
  0x23   : > { %379 = vmatpush.bf16.msra.mxu0 %v1139_v4  ;;  %478 = vmatpush.bf16.msra.mxu3 %v1145_v7  ;;  %v1153_v14 = vld [vmem:[%s1765_s3 + $0x20] sm:$0xff]  ;;  %v1162_v16 = vld [vmem:[%s1766_s4 + $0x38] sm:$0xff]  ;;  %v1147_v17 = vld [vmem:[%s1765_s3 + $0x10] sm:$0xff]  ;;  %s1596_s20 = scalar_lea.vmem [#allocation6], %s971_s24  ;;  %s785_s22 = sshll.u32 %s1592_s19, 4  ;;  %s1628_s22 = int_to_ptr.vmem [resolvable:$true] %s785_s22 }
  0x24   : > { %411 = vmatpush.bf16.msra.mxu1 %v1141_v5  ;;  %v1149_v18 = vld [vmem:[%s1766_s4 + $0x10] sm:$0xff]  ;;  %v1156_v19 = vld [vmem:[%s1766_s4 + $0x28] sm:$0xff]  ;;  %v1158_v20 = vld [vmem:[%s1764_s1 + $0x38] sm:$0xff]  ;;  %s803_s21 = sshll.u32 %s1582_s25, 4  ;;  %s820_s24 = scalar_lea.hbm %s1750_s8, %s1163_s12  ;;  %s1632_s21 = int_to_ptr.vmem [resolvable:$true] %s803_s21 }
  0x25   : > { %444 = vmatpush.bf16.msra.mxu2 %v1143_v6  ;;  %v1159_v21 = vld [vmem:[%s1765_s3 + $0x30] sm:$0xff]  ;;  %v1155_v23 = vld [vmem:[%s1766_s4 + $0x20] sm:$0xff]  ;;  %s1650_s3 = sshll.u32 %s802_s14, 4  ;;  %s821_s26 = sshll.u32 %s1596_s20, 4  ;;  %s806_s3 = int_to_ptr.hbm [resolvable:$true] %s1650_s3  ;;  %s1674_s26 = int_to_ptr.vmem [resolvable:$true] %s821_s26 }
  0x26   : > { %983 = vmatmul.msk.bf16.vlgmr.msra.gmra.mxu0 %vm368_vm0, %v349_v10  ;;  %1014 = vmatmul.msk.bf16.vlgmr.msra.gmra.mxu3 %vm368_vm0, %v349_v10  ;;  %v1161_v22 = vld [vmem:[%s1766_s4 + $0x30] sm:$0xff]  ;;  %v1233_v25 = vld [vmem:[%s1768_s2] ss:$0 sm:$0xff]  ;;  %v1235_v32 = vld [vmem:[%s1768_s2 + $0x1] ss:$0 sm:$0xff]  ;;  %s1655_s13 = sshll.u32 %s820_s24, 4  ;;  %s824_s13 = int_to_ptr.hbm [resolvable:$true] %s1655_s13 }
  0x27   : > { %613 = vmatpush.bf16.msrb.mxu3 %v1154_v9  ;;  %992 = vmatmul.msk.bf16.vlgmr.msra.gmra.mxu1 %vm368_vm0, %v349_v10  ;;  %v1157_v24 = vld [vmem:[%s1764_s1 + $0x30] sm:$0xff]  ;;  %v1234_v31 = vld [vmem:[%s1769_s5] ss:$0 sm:$0xff]  ;;  %v1236_v41 = vld [vmem:[%s1769_s5 + $0x1] ss:$0 sm:$0xff]  ;;  %s1771_s12 = sand.u32 1, %s1363_s28  }
  0x28   : > { %1001 = vmatmul.msk.bf16.vlgmr.msra.gmra.mxu2 %vm368_vm0, %v349_v10  ;;  %510 = vmatpush.bf16.msrb.mxu0 %v1148_v11  ;;  %v1237_v49 = vld [vmem:[%s1768_s2 + $0x2] ss:$0 sm:$0xff]  ;;  %v1239_v58 = vld [vmem:[%s1768_s2 + $0x3] ss:$0 sm:$0xff]  ;;  %s1648_s2 = sand.u32 1, %s1770_s11   ;;  %s762_s16 = scalar_lea.sflag [#allocation3], %s1771_s12 }
  0x29   : > { %580 = vmatpush.bf16.msrb.mxu2 %v1152_v8  ;;  %545 = vmatpush.bf16.msrb.mxu1 %v1150_v12  ;;  %v1238_v57 = vld [vmem:[%s1769_s5 + $0x2] ss:$0 sm:$0xff]  ;;  %v1240_v3 = vld [vmem:[%s1769_s5 + $0x3] ss:$0 sm:$0xff]  ;;  %s1255_s0 = sshra.s32 %s788_s30, 4  ;;  %s1261_s14 = scalar_lea.hbm %s1748_s6, 32  ;;  %s1256_s0 = int_to_ptr.hbm [resolvable:$true] %s1255_s0 }
  0x2a   : > { %s1257_s1 = scalar_lea.hbm %s1256_s0, 16  ;;  %p1262_p1 = scmp.lt.s32.totalorder %s1256_s0, %s1748_s6 }
  0x2b   : > { %614 = vmatpush.bf16.msrb.mxu3 %v1153_v14  ;;  %p1258_p12 = scmp.ne.s32.totalorder %s1256_s0, %s1257_s1  ;;  %p1263_p2 = scmp.lt.s32.totalorder %s1261_s14, %s1257_s1 }
  0x2c   : > { %511 = vmatpush.bf16.msrb.mxu0 %v1147_v17 }
  0x2d   : > { %581 = vmatpush.bf16.msrb.mxu2 %v1151_v13  ;;  %546 = vmatpush.bf16.msrb.mxu1 %v1149_v18  ;;  %p1259_p13 = pnand %p1258_p12, %p1470_p4  ;;  %p1264_p3 = por %p1263_p2, %p1262_p1 }
  0x2f   : > { %751 = vmatpush.bf16.msra.mxu3 %v1162_v16  ;;  %p1260_p0 = pneg %p1259_p13 }
  0x30   : > { %648 = vmatpush.bf16.msra.mxu0 %v1156_v19 }
  0x31   : > { %716 = vmatpush.bf16.msra.mxu2 %v1160_v15  ;;  %683 = vmatpush.bf16.msra.mxu1 %v1158_v20  ;;  %p1265_p5 = pnand %p1264_p3, %p1260_p0 }
  0x33   : > { %752 = vmatpush.bf16.msra.mxu3 %v1161_v22 }
  0x34   : > { %649 = vmatpush.bf16.msra.mxu0 %v1155_v23 }
  0x35   : > { %717 = vmatpush.bf16.msra.mxu2 %v1159_v21  ;;  %684 = vmatpush.bf16.msra.mxu1 %v1157_v24 }
  0x36   : > { %1028 = vmatmul.msk.bf16.vlgmr.msrb.gmra.mxu0 %vm368_vm0, %v349_v10  ;;  %1070 = vmatmul.msk.bf16.vlgmr.msrb.gmra.mxu3 %vm368_vm0, %v349_v10 }
  0x37   : > { %1042 = vmatmul.msk.bf16.vlgmr.msrb.gmra.mxu1 %vm368_vm0, %v349_v10 }
  0x38   : > { %1056 = vmatmul.msk.bf16.vlgmr.msrb.gmra.mxu2 %vm368_vm0, %v349_v10 }
  0x46   : > { %1084 = vmatmul.msk.bf16.vlgmr.msra.gmra.mxu0 %vm368_vm0, %v349_v10  ;;  %1126 = vmatmul.msk.bf16.vlgmr.msra.gmra.mxu3 %vm368_vm0, %v349_v10 }
  0x47   : > { %1098 = vmatmul.msk.bf16.vlgmr.msra.gmra.mxu1 %vm368_vm0, %v349_v10 }
  0x48   : > { %1112 = vmatmul.msk.bf16.vlgmr.msra.gmra.mxu2 %vm368_vm0, %v349_v10 }
  0xa3   : > { %v381_v26 = vpop.f32.mrf.mxu0 }
  0xa4   : > { %v413_v27 = vpop.f32.mrf.mxu1  ;;  %v382_v28 = vadd.f32 %v1233_v25, %v381_v26 }
  0xa5   : > { %v417_v29 = vpack.c.bf16 %v413_v27, %v413_v27 }
  0xa6   : > { %v385_v30 = vpack.c.bf16 %v382_v28, %v382_v28 }
  0xa7   : > { %418 = vst.msk [vmem:[%s1582_s25] sm:$0xf] %vm386_vm1, %v417_v29 }
  0xa8   : > { %387 = vst.msk [vmem:[%s1592_s19] sm:$0xf] %vm386_vm1, %v385_v30 }
  0xa9   : > { %v480_v34 = vpop.f32.mrf.mxu3 }
  0xaa   : > { %v481_v36 = vadd.f32 %v1235_v32, %v480_v34 }
  0xab   : > { %v446_v33 = vpop.f32.mrf.mxu2  ;;  %v383_v37 = vpop.f32.mrf.mxu0 }
  0xac   : > { %v447_v35 = vadd.f32 %v1234_v31, %v446_v33  ;;  %v415_v38 = vpop.f32.mrf.mxu1  ;;  %v484_v40 = vpack.c.bf16 %v481_v36, %v481_v36 }
  0xae   : > { %v450_v39 = vpack.c.bf16 %v447_v35, %v447_v35  ;;  %1015 = vst.msk [vmem:[%s1592_s19 + $0x4] sm:$0xf] %vm386_vm1, %v484_v40 }
  0xb0   : > { %451 = vst.msk [vmem:[%s1596_s20] sm:$0xf] %vm386_vm1, %v450_v39 }
  0xb1   : > { %v482_v43 = vpop.f32.mrf.mxu3 }
  0xb3   : > { %v448_v42 = vpop.f32.mrf.mxu2  ;;  %v513_v44 = vpop.f32.mrf.mxu0 }
  0xb4   : > { %v548_v45 = vpop.f32.mrf.mxu1  ;;  %v517_v46 = vpack.c.bf16 %v513_v44, %v513_v44 }
  0xb5   : > { %v549_v47 = vadd.f32 %v1236_v41, %v548_v45 }
  0xb6   : > { %1029 = vst.msk [vmem:[%s1582_s25 + $0x4] sm:$0xf] %vm386_vm1, %v517_v46 }
  0xb7   : > { %v552_v48 = vpack.c.bf16 %v549_v47, %v549_v47 }
  0xb9   : > { %1043 = vst.msk [vmem:[%s1596_s20 + $0x4] sm:$0xf] %vm386_vm1, %v552_v48  ;;  %v616_v51 = vpop.f32.mrf.mxu3 }
  0xba   : > { %v620_v53 = vpack.c.bf16 %v616_v51, %v616_v51 }
  0xbb   : > { %v583_v50 = vpop.f32.mrf.mxu2  ;;  %v515_v54 = vpop.f32.mrf.mxu0 }
  0xbc   : > { %v584_v52 = vadd.f32 %v1237_v49, %v583_v50  ;;  %v550_v55 = vpop.f32.mrf.mxu1  ;;  %1071 = vst.msk [vmem:[%s1582_s25 + $0x8] sm:$0xf] %vm386_vm1, %v620_v53 }
  0xbe   : > { %v587_v56 = vpack.c.bf16 %v584_v52, %v584_v52 }
  0xc0   : > { %1057 = vst.msk [vmem:[%s1592_s19 + $0x8] sm:$0xf] %vm386_vm1, %v587_v56 }
  0xc1   : > { %v618_v60 = vpop.f32.mrf.mxu3 }
  0xc3   : > { %v585_v59 = vpop.f32.mrf.mxu2  ;;  %v651_v61 = vpop.f32.mrf.mxu0 }
  0xc4   : > { %v686_v62 = vpop.f32.mrf.mxu1  ;;  %v652_v63 = vadd.f32 %v1238_v57, %v651_v61 }
  0xc5   : > { %v687_v0 = vadd.f32 %v1239_v58, %v686_v62 }
  0xc6   : > { %v655_v1 = vpack.c.bf16 %v652_v63, %v652_v63 }
  0xc7   : > { %v690_v2 = vpack.c.bf16 %v687_v0, %v687_v0 }
  0xc8   : > { %1085 = vst.msk [vmem:[%s1596_s20 + $0x8] sm:$0xf] %vm386_vm1, %v655_v1 }
  0xc9   : > { %1099 = vst.msk [vmem:[%s1592_s19 + $0xc] sm:$0xf] %vm386_vm1, %v690_v2  ;;  %v754_v5 = vpop.f32.mrf.mxu3 }
  0xcb   : > { %v719_v4 = vpop.f32.mrf.mxu2 }
  0xcc   : > { %1268 = shalt.err (!%p1265_p5)
}
  0xcd   : > { %s1381_s19 = smov 64   ;;  %s1382_s24 = smov 4   ;;  %v723_v6 = vpack.c.bf16 %v719_v4, %v719_v4  ;;  %v755_v7 = vadd.f32 %v1240_v3, %v754_v5  ;;  %v653_v8 = vpop.f32.mrf.mxu0  ;;  %v688_v9 = vpop.f32.mrf.mxu1 }
  0xce   : > { %1166 = dma.vmem_to_hbm [thread:$0]  (%p1470_p4), %s1628_s22, 256, %s788_s30, %s762_s16, %s1381_s19, %s1381_s19, %s1382_s24  }
  0xcf   : > { %1113 = vst.msk [vmem:[%s1582_s25 + $0xc] sm:$0xf] %vm386_vm1, %v723_v6  ;;  %v758_v10 = vpack.c.bf16 %v755_v7, %v755_v7  ;;  %s767_s4 = scalar_lea.sflag [#allocation5], %s1648_s2  ;;  %s1283_s5 = sshra.s32 %s806_s3, 4  ;;  %s1284_s5 = int_to_ptr.hbm [resolvable:$true] %s1283_s5 }
  0xd0   : > { %s1285_s12 = scalar_lea.hbm %s1284_s5, 16  ;;  %s1289_s16 = scalar_lea.hbm %s1749_s7, 32 }
  0xd1   : > { %p1286_p6 = scmp.ne.s32.totalorder %s1284_s5, %s1285_s12  ;;  %p1290_p10 = scmp.lt.s32.totalorder %s1284_s5, %s1749_s7 }
  0xd2   : > { %p1291_p11 = scmp.lt.s32.totalorder %s1289_s16, %s1285_s12 }
  0xd3   : > { %p1287_p7 = pnand %p1286_p6, %p1470_p4 }
  0xd4   : > { %p1292_p12 = por %p1291_p11, %p1290_p10 }
  0xd5   : > { %p1288_p9 = pneg %p1287_p7 }
  0xd7   : > { %p1293_p13 = pnand %p1292_p12, %p1288_p9 }
  0xd9   : > { %1296 = shalt.err (!%p1293_p13)
}
  0xda   : > { %1167 = dma.vmem_to_hbm [thread:$0]  (%p1470_p4), %s1632_s21, 256, %s806_s3, %s767_s4, %s1381_s19, %s1381_s19, %s1382_s24  }
  0xdb   : > { %1127 = vst.msk [vmem:[%s1596_s20 + $0xc] sm:$0xf] %vm386_vm1, %v758_v10  ;;  %s1311_s25 = sshra.s32 %s824_s13, 4  ;;  %s1317_s5 = scalar_lea.hbm %s1750_s8, 32  ;;  %s1312_s25 = int_to_ptr.hbm [resolvable:$true] %s1311_s25 }
  0xdc   : > { %s1313_s23 = scalar_lea.hbm %s1312_s25, 16  ;;  %p1318_p3 = scmp.lt.s32.totalorder %s1312_s25, %s1750_s8 }
  0xdd   : > { %p1314_p0 = scmp.ne.s32.totalorder %s1312_s25, %s1313_s23  ;;  %p1319_p5 = scmp.lt.s32.totalorder %s1317_s5, %s1313_s23 }
  0xdf   : > { %p1315_p1 = pnand %p1314_p0, %p1470_p4  ;;  %p1320_p6 = por %p1319_p5, %p1318_p3 }
  0xe1   : > { %p1316_p2 = pneg %p1315_p1 }
  0xe3   : > { %p1321_p7 = pnand %p1320_p6, %p1316_p2 }
  0xe5   : > { %1324 = shalt.err (!%p1321_p7)
}
  0xe6   : > { %1168 = dma.vmem_to_hbm [thread:$0]  (%p1470_p4), %s1674_s26, 256, %s824_s13, %s767_s4, %s1381_s19, %s1381_s19, %s1382_s24   ;;  %v721_v11 = vpop.f32.mrf.mxu2  ;;  %v756_v12 = vpop.f32.mrf.mxu3 }
  0xe7 PF: > { %p1182_p9 = scmp.ge.s32.totalorder %s1379_s10, 2  ;;  %s838_s3 = sand.u32 1, %s1359_s27  }
  0xe8   : > { %s839_s15 = scalar_lea.sflag [#allocation3], %s838_s3 }
  0xe9   : > { %p1173_p10 = pnand %p1182_p9, %p1479_p8 }
  0xeb   : > { %p1174_p11 = pneg %p1173_p10 }
  0xed   : > { %1350 = dma.done.wait (%p1174_p11), %s839_s15, 256  }
  0xee   : > { %1352 = vsyncadd (%p1174_p11), %s839_s15, 4294967040  ;;  %s1772_s2 = sadd.s32 4294967294, %s1379_s10  }
  0xef   : > { %s848_s21 = sand.u32 1, %s1772_s2  }
  0xf0   : > { %s849_s20 = scalar_lea.sflag [#allocation5], %s848_s21 }
  0xf1   : > { %1354 = dma.done.wait (%p1174_p11), %s849_s20, 512  }
  0xf2   : > { %1356 = vsyncadd (%p1174_p11), %s849_s20, 4294966784  ;;  %s25_s10 = sadd.s32 1, %s1379_s10   ;;  %s1773_s26 = sld [smem:[#allocation9_spill]] }
  0xf3   : > { %p22_p4 = scmp.ge.s32.totalorder %s25_s10, 4   ;;  %s1774_s27 = smov %s1363_s28 }
  0xf4   : > { %s1775_s28 = smov %s1367_s29  ;;  %s1776_s29 = smov %s1485_s18 }
  0xf5   : > { %s1777_s30 = smov %s1375_s9  ;;  %24 = sbr.rel (!%p22_p4) target bundleno = 13 (0xd), region = 129 }
  0xf8   : > { %s1778_s9 = smov %s1773_s26 }
  0xfa   :  { %865 = vsyncpa [#allocation3], 1 }
  0xfb   :  { %867 = vsyncpa [#allocation3 + $0x1], 1 }
  0xfc   :  { %868 = vsyncpa [#allocation5], 1 }
  0xfd   :  { %870 = vsyncpa [#allocation5 + $0x1], 1 }

</bundles_post_ra>
